<compile_context>
chip_gen: v7x
topology: tpu7x:2x2x1
jax: 0.10.0
libtpu: 0.0.40
codegen_flags: <defaults>
</compile_context>

<pallas_src>
import functools
import math

import jax
import jax.numpy as jnp
from jax.experimental import pallas as pl
from jax.experimental.pallas import tpu as pltpu

_HALF_LOG_2PI = 0.5 * math.log(2.0 * math.pi)
_LANE = 128


def _round_up(n, m):
    return ((n + m - 1) // m) * m


def _cdiv(a, b):
    return -(-a // b)


def _policy_kernel(x_ref, w1_ref, b1_ref, wh_ref, bh_ref, eps_ref, out_ref, *,
                   action_dim):
    # Feature-major layout: batch is the lane (fast) axis everywhere.
    # fc1 + ReLU:  (hidden, S) @ (S, tb) -> (hidden, tb), f32 accumulation.
    h = jnp.dot(w1_ref[...], x_ref[...], preferred_element_type=jnp.float32)
    h = jnp.maximum(h + b1_ref[...], 0.0)

    # fused mu|pre_std heads: (2A, hidden) @ (hidden, tb) -> (2A, tb)
    heads = jnp.dot(wh_ref[...], h.astype(jnp.bfloat16),
                    preferred_element_type=jnp.float32) + bh_ref[...]
    mu = heads[:action_dim, :]
    pre_std = heads[action_dim:, :]

    # softplus (numerically stable): log(1 + exp(x)) == logaddexp(x, 0)
    std = jnp.logaddexp(pre_std, 0.0)
    log_std = jnp.log(std)                      # computed once, reused

    eps = eps_ref[...]
    # Normal(mu, std).log_prob(mu + std*eps): -0.5*((z-mu)/std)^2 == -0.5*eps^2
    log_prob = (-0.5) * jnp.square(eps) - log_std - _HALF_LOG_2PI

    # reparameterized sample + tanh squash
    z = mu + std * eps
    action = jnp.tanh(z)
    # NOTE: the PyTorch source applies tanh to `action` *again* — reproduced on purpose.
    log_prob = log_prob - jnp.log(1.0 - jnp.square(jnp.tanh(action)) + 1e-07)

    # lane-dense output slab [action ; log_prob] along the sublane axis
    out_ref[:action_dim, :] = action
    out_ref[action_dim:, :] = log_prob


def prepare_params(params):
    """One-time param prep (hoisted out of the per-call forward):
    fuse the mu/std heads, transpose to feature-major, cast weights to bf16."""
    w1, b1, wmu, bmu, wstd, bstd = params
    w1_t = jnp.asarray(w1, jnp.float32).T.astype(jnp.bfloat16)          # (H, S)
    b1_t = jnp.asarray(b1, jnp.float32).reshape(-1, 1)                  # (H, 1)
    wh_t = jnp.concatenate([wmu, wstd], axis=1).T.astype(jnp.bfloat16)  # (2A, H)
    bh_t = jnp.concatenate([bmu, bstd], axis=1).astype(jnp.float32).reshape(-1, 1)  # (2A, 1)
    return w1_t, b1_t, wh_t, bh_t


@functools.partial(jax.jit, static_argnames=("block_batch",))
def policy_net_continuous(x, prepared_params, eps, *, block_batch=2048):
    """SAC continuous policy forward pass as one pipelined, lane-dense Pallas kernel."""
    w1_t, b1_t, wh_t, bh_t = prepared_params
    batch, state_dim = x.shape
    hidden_dim = w1_t.shape[0]
    action_dim = wh_t.shape[0] // 2

    # Batch tiling: lane-aligned (multiples of 128); >= 2 tiles when possible so the
    # "parallel" grid axis keeps both v7x TensorCores busy; big tiles amortize the
    # per-grid-step overhead (VMEM per tile is tens of KiB -> never a concern).
    block_batch = max(_LANE, _round_up(block_batch, _LANE))
    padded0 = _round_up(batch, _LANE)
    n_tiles = max(1, _cdiv(padded0, block_batch))
    if n_tiles == 1 and padded0 >= 2 * _LANE:
        n_tiles = 2
    tb = _round_up(_cdiv(padded0, n_tiles), _LANE)
    padded = tb * n_tiles

    # Feature-major inputs: batch on the lane axis, x streamed as bf16.
    x_t = jnp.pad(x.T.astype(jnp.bfloat16), ((0, 0), (0, padded - batch)))
    eps_t = jnp.pad(eps.T.astype(jnp.float32), ((0, 0), (0, padded - batch)))

    kernel = functools.partial(_policy_kernel, action_dim=action_dim)

    flops = 2 * padded * (state_dim * hidden_dim + hidden_dim * 2 * action_dim)
    # per element: exp + log1p (softplus), log(std), tanh(z), tanh(action), log(1-t^2)
    transcendentals = padded * 6 * action_dim
    bytes_accessed = (x_t.size * 2 + eps_t.size * 4
                      + w1_t.size * 2 + wh_t.size * 2
                      + b1_t.size * 4 + bh_t.size * 4
                      + padded * 2 * action_dim * 4)

    out = pl.pallas_call(
        kernel,
        out_shape=jax.ShapeDtypeStruct((2 * action_dim, padded), jnp.float32),
        grid_spec=pltpu.PrefetchScalarGridSpec(
            num_scalar_prefetch=0,
            grid=(n_tiles,),
            in_specs=[
                pl.BlockSpec((state_dim, tb), lambda i: (0, i)),              # x.T tile
                pl.BlockSpec((hidden_dim, state_dim), lambda i: (0, 0)),      # W1.T (resident)
                pl.BlockSpec((hidden_dim, 1), lambda i: (0, 0)),              # b1 (resident)
                pl.BlockSpec((2 * action_dim, hidden_dim), lambda i: (0, 0)),  # [Wmu|Wstd].T
                pl.BlockSpec((2 * action_dim, 1), lambda i: (0, 0)),          # [bmu|bstd]
                pl.BlockSpec((action_dim, tb), lambda i: (0, i)),             # eps.T tile
            ],
            out_specs=pl.BlockSpec((2 * action_dim, tb), lambda i: (0, i)),
        ),
        compiler_params=pltpu.CompilerParams(
            dimension_semantics=("parallel",)),
        cost_estimate=pl.CostEstimate(
            flops=flops,
            transcendentals=transcendentals,
            bytes_accessed=bytes_accessed),
    )(x_t, w1_t, b1_t, wh_t, bh_t, eps_t)

    action = out[:action_dim, :batch].T
    log_prob = out[action_dim:, :batch].T
    return action, log_prob


def init_params(key, state_dim, hidden_dim, action_dim):
    """Deterministic init mimicking torch.nn.Linear defaults (U(-1/sqrt(in), 1/sqrt(in)))."""
    keys = jax.random.split(key, 6)

    def linear(kw, kb, fan_in, fan_out):
        bound = 1.0 / math.sqrt(fan_in)
        w = jax.random.uniform(kw, (fan_in, fan_out), jnp.float32, -bound, bound)
        b = jax.random.uniform(kb, (1, fan_out), jnp.float32, -bound, bound)
        return w, b

    w1, b1 = linear(keys[0], keys[1], state_dim, hidden_dim)
    wmu, bmu = linear(keys[2], keys[3], hidden_dim, action_dim)
    wstd, bstd = linear(keys[4], keys[5], hidden_dim, action_dim)
    return (w1, b1, wmu, bmu, wstd, bstd)


def _reference(x, params, eps):
    """Pure-JAX f32 reference for a loose correctness check."""
    w1, b1, wmu, bmu, wstd, bstd = params
    h = jnp.maximum(x @ w1 + b1, 0.0)
    mu = h @ wmu + bmu
    std = jnp.logaddexp(h @ wstd + bstd, 0.0)
    z = mu + std * eps
    logp = -0.5 * jnp.square(eps) - jnp.log(std) - _HALF_LOG_2PI
    action = jnp.tanh(z)
    logp = logp - jnp.log(1.0 - jnp.square(jnp.tanh(action)) + 1e-07)
    return action, logp


if __name__ == "__main__":
    batch = 2
    state_dim = 16
    hidden_dim = 32
    action_dim = 4

    key = jax.random.PRNGKey(0)
    k_params, k_x, k_eps = jax.random.split(key, 3)

    params = init_params(k_params, state_dim, hidden_dim, action_dim)
    prepared = prepare_params(params)   # hoisted: fuse heads / transpose / bf16 cast once
    x = jax.random.normal(k_x, (batch, state_dim), dtype=jnp.float32)
    # TODO(synk): eps (rsample noise) is generated outside the kernel; could be moved
    # in-kernel with pltpu.prng_seed/prng_random_bits if external reproducibility is
    # not required.
    eps = jax.random.normal(k_eps, (batch, action_dim), dtype=jnp.float32)

    action, log_prob = policy_net_continuous(x, prepared, eps)
    jax.block_until_ready((action, log_prob))

    assert action.shape == (batch, action_dim)
    assert log_prob.shape == (batch, action_dim)
    assert bool(jnp.all(jnp.isfinite(action))) and bool(jnp.all(jnp.isfinite(log_prob)))

    # Loose tolerance: kernel runs matmuls with bf16 operands (f32 accumulation).
    ref_action, ref_logp = _reference(x, params, eps)
    assert bool(jnp.allclose(action, ref_action, atol=5e-2, rtol=5e-2))
    assert bool(jnp.allclose(log_prob, ref_logp, atol=5e-2, rtol=5e-2))

    print("KERNEL_OK")
</pallas_src>

<mosaic_0001>
module attributes {stable_mosaic.version = 11 : i64} {
  func.func @_policy_kernel(%arg0: i32, %arg1: memref<16x128xbf16, #tpu.memory_space<vmem>>, %arg2: memref<32x16xbf16, #tpu.memory_space<vmem>>, %arg3: memref<32x1xf32, #tpu.memory_space<vmem>>, %arg4: memref<8x32xbf16, #tpu.memory_space<vmem>>, %arg5: memref<8x1xf32, #tpu.memory_space<vmem>>, %arg6: memref<4x128xf32, #tpu.memory_space<vmem>>, %arg7: memref<8x128xf32, #tpu.memory_space<vmem>>) attributes {dimension_semantics = [#tpu.dimension_semantics<parallel>], iteration_bounds = array<i64: 1>, scalar_prefetch = 0 : i64, scratch_operands = 0 : i64, tpu.core_type = #tpu.core_type<tc>, window_params = [{transform_indices = @transform_0, window_bounds = array<i64: 16, 128>}, {pipeline_mode = #tpu.pipeline_mode<synchronous>, transform_indices = @transform_1, window_bounds = array<i64: 32, 16>}, {pipeline_mode = #tpu.pipeline_mode<synchronous>, transform_indices = @transform_2, window_bounds = array<i64: 32, 1>}, {pipeline_mode = #tpu.pipeline_mode<synchronous>, transform_indices = @transform_3, window_bounds = array<i64: 8, 32>}, {pipeline_mode = #tpu.pipeline_mode<synchronous>, transform_indices = @transform_4, window_bounds = array<i64: 8, 1>}, {transform_indices = @transform_5, window_bounds = array<i64: 4, 128>}, {transform_indices = @transform_6, window_bounds = array<i64: 8, 128>}]} {
    %c0 = arith.constant 0 : index
    %c0_0 = arith.constant 0 : index
    %0 = vector.load %arg2[%c0, %c0_0] : memref<32x16xbf16, #tpu.memory_space<vmem>>, vector<32x16xbf16>
    %c0_1 = arith.constant 0 : index
    %c0_2 = arith.constant 0 : index
    %1 = vector.load %arg1[%c0_1, %c0_2] : memref<16x128xbf16, #tpu.memory_space<vmem>>, vector<16x128xbf16>
    %cst = arith.constant dense<0.000000e+00> : vector<32x128xf32>
    %2 = tpu.matmul %0, %1, %cst {dimension_numbers = #tpu.dot_dimension_numbers<[1], [0], [0], [1], [0, 0, 1, 1], [], []>} : vector<32x16xbf16>, vector<16x128xbf16>, vector<32x128xf32> -> vector<32x128xf32>
    %c0_3 = arith.constant 0 : index
    %c0_4 = arith.constant 0 : index
    %3 = vector.load %arg3[%c0_3, %c0_4] : memref<32x1xf32, #tpu.memory_space<vmem>>, vector<32x1xf32>
    %4 = vector.broadcast %3 : vector<32x1xf32> to vector<32x128xf32>
    %5 = arith.addf %2, %4 : vector<32x128xf32>
    %cst_5 = arith.constant 0.000000e+00 : f32
    %6 = vector.broadcast %cst_5 : f32 to vector<32x128xf32>
    %7 = arith.maximumf %5, %6 : vector<32x128xf32>
    %c0_6 = arith.constant 0 : index
    %c0_7 = arith.constant 0 : index
    %8 = vector.load %arg4[%c0_6, %c0_7] : memref<8x32xbf16, #tpu.memory_space<vmem>>, vector<8x32xbf16>
    %9 = arith.truncf %7 : vector<32x128xf32> to vector<32x128xbf16>
    %cst_8 = arith.constant dense<0.000000e+00> : vector<8x128xf32>
    %10 = tpu.matmul %8, %9, %cst_8 {dimension_numbers = #tpu.dot_dimension_numbers<[1], [0], [0], [1], [0, 0, 1, 1], [], []>} : vector<8x32xbf16>, vector<32x128xbf16>, vector<8x128xf32> -> vector<8x128xf32>
    %c0_9 = arith.constant 0 : index
    %c0_10 = arith.constant 0 : index
    %11 = vector.load %arg5[%c0_9, %c0_10] : memref<8x1xf32, #tpu.memory_space<vmem>>, vector<8x1xf32>
    %12 = vector.broadcast %11 : vector<8x1xf32> to vector<8x128xf32>
    %13 = arith.addf %10, %12 : vector<8x128xf32>
    %14 = vector.extract_strided_slice %13 {offsets = [0, 0], sizes = [4, 128], strides = [1, 1]} : vector<8x128xf32> to vector<4x128xf32>
    %15 = vector.extract_strided_slice %13 {offsets = [4, 0], sizes = [4, 128], strides = [1, 1]} : vector<8x128xf32> to vector<4x128xf32>
    %cst_11 = arith.constant 0.000000e+00 : f32
    %16 = vector.broadcast %cst_11 : f32 to vector<4x128xf32>
    %17 = arith.maximumf %15, %16 : vector<4x128xf32>
    %18 = vector.broadcast %cst_11 : f32 to vector<4x128xf32>
    %19 = arith.subf %15, %18 : vector<4x128xf32>
    %20 = arith.cmpf one, %19, %19 : vector<4x128xf32>
    %21 = vector.broadcast %cst_11 : f32 to vector<4x128xf32>
    %22 = arith.addf %15, %21 : vector<4x128xf32>
    %23 = math.absf %19 : vector<4x128xf32>
    %cst_12 = arith.constant 0.000000e+00 : f32
    %24 = vector.broadcast %cst_12 : f32 to vector<4x128xf32>
    %25 = arith.subf %24, %23 : vector<4x128xf32>
    %26 = math.exp %25 : vector<4x128xf32>
    %27 = math.log1p %26 : vector<4x128xf32>
    %28 = arith.addf %17, %27 : vector<4x128xf32>
    %29 = arith.select %20, %22, %28 : vector<4x128xi1>, vector<4x128xf32>
    %30 = math.log %29 : vector<4x128xf32>
    %c0_13 = arith.constant 0 : index
    %c0_14 = arith.constant 0 : index
    %31 = vector.load %arg6[%c0_13, %c0_14] : memref<4x128xf32, #tpu.memory_space<vmem>>, vector<4x128xf32>
    %32 = arith.mulf %31, %31 : vector<4x128xf32>
    %cst_15 = arith.constant -5.000000e-01 : f32
    %33 = vector.broadcast %cst_15 : f32 to vector<4x128xf32>
    %34 = arith.mulf %33, %32 : vector<4x128xf32>
    %35 = arith.subf %34, %30 : vector<4x128xf32>
    %cst_16 = arith.constant 0.918938517 : f32
    %36 = vector.broadcast %cst_16 : f32 to vector<4x128xf32>
    %37 = arith.subf %35, %36 : vector<4x128xf32>
    %38 = arith.mulf %29, %31 : vector<4x128xf32>
    %39 = arith.addf %14, %38 : vector<4x128xf32>
    %40 = math.tanh %39 : vector<4x128xf32>
    %41 = math.tanh %40 : vector<4x128xf32>
    %42 = arith.mulf %41, %41 : vector<4x128xf32>
    %cst_17 = arith.constant 1.000000e+00 : f32
    %43 = vector.broadcast %cst_17 : f32 to vector<4x128xf32>
    %44 = arith.subf %43, %42 : vector<4x128xf32>
    %cst_18 = arith.constant 1.000000e-07 : f32
    %45 = vector.broadcast %cst_18 : f32 to vector<4x128xf32>
    %46 = arith.addf %44, %45 : vector<4x128xf32>
    %47 = math.log %46 : vector<4x128xf32>
    %48 = arith.subf %37, %47 : vector<4x128xf32>
    %c0_19 = arith.constant 0 : index
    %c0_20 = arith.constant 0 : index
    %49 = vector.load %arg7[%c0_19, %c0_20] : memref<8x128xf32, #tpu.memory_space<vmem>>, vector<4x128xf32>
    tpu.vector_store %arg7[%c0_19, %c0_20], %40 {strides = array<i32>} : memref<8x128xf32, #tpu.memory_space<vmem>>, vector<4x128xf32>,
    %c4 = arith.constant 4 : index
    %c0_21 = arith.constant 0 : index
    %50 = vector.load %arg7[%c4, %c0_21] : memref<8x128xf32, #tpu.memory_space<vmem>>, vector<4x128xf32>
    tpu.vector_store %arg7[%c4, %c0_21], %48 {strides = array<i32>} : memref<8x128xf32, #tpu.memory_space<vmem>>, vector<4x128xf32>,
    return
  }
  func.func @transform_0(%arg0: i32) -> (i32, i32) {
    %c0_i32 = arith.constant 0 : i32
    %c0_i32_0 = arith.constant 0 : i32
    return %c0_i32, %arg0 : i32, i32
  }
  func.func @transform_1(%arg0: i32) -> (i32, i32) {
    %c0_i32 = arith.constant 0 : i32
    %c0_i32_0 = arith.constant 0 : i32
    %c0_i32_1 = arith.constant 0 : i32
    return %c0_i32, %c0_i32_0 : i32, i32
  }
  func.func @transform_2(%arg0: i32) -> (i32, i32) {
    %c0_i32 = arith.constant 0 : i32
    %c0_i32_0 = arith.constant 0 : i32
    %c0_i32_1 = arith.constant 0 : i32
    return %c0_i32, %c0_i32_0 : i32, i32
  }
  func.func @transform_3(%arg0: i32) -> (i32, i32) {
    %c0_i32 = arith.constant 0 : i32
    %c0_i32_0 = arith.constant 0 : i32
    %c0_i32_1 = arith.constant 0 : i32
    return %c0_i32, %c0_i32_0 : i32, i32
  }
  func.func @transform_4(%arg0: i32) -> (i32, i32) {
    %c0_i32 = arith.constant 0 : i32
    %c0_i32_0 = arith.constant 0 : i32
    %c0_i32_1 = arith.constant 0 : i32
    return %c0_i32, %c0_i32_0 : i32, i32
  }
  func.func @transform_5(%arg0: i32) -> (i32, i32) {
    %c0_i32 = arith.constant 0 : i32
    %c0_i32_0 = arith.constant 0 : i32
    return %c0_i32, %arg0 : i32, i32
  }
  func.func @transform_6(%arg0: i32) -> (i32, i32) {
    %c0_i32 = arith.constant 0 : i32
    %c0_i32_0 = arith.constant 0 : i32
    return %c0_i32, %arg0 : i32, i32
  }
}

</mosaic_0001>

<bundles_post_ra>
// kernel: policy_net_continuous.1
= control target key start
LH: loop header
LB: loop body
LE: loop exit
PB: predicated region body
PF: predicated region fallthrough
CT: control target
= control target key end

     0   :  { %vm70_vm0 = vcmask 130048   ;;  %v280_v1 = vmov 0   ;;  %v281_v9 = vmov 0.0   ;;  %vm282_vm1 = vmmov 0   ;;  %s356_s0 = inlined_call_operand.vmem [shape: bf16[16,128], index: 0, kind: input, shape index: {}]   ;;  %s357_s1 = inlined_call_operand.vmem [shape: bf16[32,16], index: 1, kind: input, shape index: {}]   ;;  %s358_s2 = inlined_call_operand.vmem [shape: f32[32,1], index: 2, kind: input, shape index: {}]   ;;  %s359_s4 = inlined_call_operand.vmem [shape: f32[8,1], index: 4, kind: input, shape index: {}]   ;;  %s360_s3 = inlined_call_operand.vmem [shape: bf16[8,32], index: 3, kind: input, shape index: {}]   ;;  %s361_s5 = inlined_call_operand.vmem [shape: f32[4,128], index: 5, kind: input, shape index: {}]   ;;  %s362_s6 = inlined_call_operand.vmem [shape: f32[8,128], index: 6, kind: output, shape index: {}]  }
   0x1   :  { %v265_v0 = vld [vmem:[%s356_s0] sm:$0xff]   ;;  %263 = vset.pattern.permute.xlu0 %v280_v1  ;;  %264 = vset.pattern.permute.xlu1 %v280_v1  ;;  %v267_v3 = vld [vmem:[%s357_s1 + $0x8] sm:$0xff]   ;;  %v32_v5 = vld [vmem:[%s358_s2 + $0x10] sm:$0xff]  ;;  %vm139_vm2 = vcmask 261120  }
   0x2   :  { %v266_v2 = vld [vmem:[%s357_s1] sm:$0xff]   ;;  %246 = vmatprep.subr.bf16.mxu0 %v265_v0  ;;  %46 = vperm.xlu1 %264, %v32_v5   ;;  %v31_v6 = vld [vmem:[%s358_s2 + $0x8] sm:$0xff]  ;;  %v33_v7 = vld [vmem:[%s358_s2 + $0x18] sm:$0xff] }
   0x3   :  { %247 = vmatpush3.bf16.msra.mxu0 %v265_v0  ;;  %248 = vmatprep.mubr.msk.bf16.mxu0 %vm70_vm0, %v266_v2  ;;  %v30_v4 = vld [vmem:[%s358_s2] sm:$0xff] }
   0x4   :  { %36 = vperm.xlu0 %263, %v30_v4   ;;  %v133_v8 = vld [vmem:[%s359_s4] sm:$0xff]  ;;  %252 = vmatprep.subr.bf16.mxu1 %v281_v9 }
   0x5   :  { %256 = vmatprep.mubr.msk.bf16.mxu1 %vm282_vm1, %v281_v9  ;;  %v130_v28 = vld [vmem:[%s360_s3] sm:$0xf] }
   0x6   :  { %249 = vmatmul.mubr.msk.bf16.vlgmr.msra.gmra.mrb[0].mxu0 %vm70_vm0, %v267_v3  ;;  %51 = vperm.xlu1 %264, %v33_v7   ;;  %v203_v44 = vld [vmem:[%s361_s5] sm:$0xf] }
   0x7   :  { %v212_v49 = vrot.slane %v203_v44, 4  ;;  %v204_v62 = vmul.f32 %v203_v44, %v203_v44 }
   0x8   :  { %41 = vperm.xlu0 %263, %v31_v6  }
   0x9   :  { %v205_v63 = vmul.f32 -0.5, %v204_v62 }
   0xc   :  { %136 = vperm.xlu0 %263, %v133_v8  }
  0x81   :  { %v47_v10 = vpop.permute.xlu1 %46 }
  0x83   :  { %v37_v11 = vpop.permute.xlu0 %36 }
  0x85   :  { %v52_v13 = vpop.permute.xlu1 %51 }
  0x87   :  { %v42_v18 = vpop.permute.xlu0 %41 }
  0x8b   :  { %v137_v29 = vpop.permute.xlu0 %136 }
  0xd9   :  { %v250_v12 = vpop.f32.mrb[0].mxu0 }
  0xda   :  { %v120_v14 = vadd.f32 %v250_v12, %v47_v10  ;;  %v111_v15 = vpop.f32.mrb[1].mxu0 }
  0xdb   :  { %v112_v16 = vadd.f32 %v111_v15, %v37_v11  ;;  %v251_v17 = vpop.f32.mrb[2].mxu0 }
  0xdc   :  { %v123_v19 = vadd.f32 %v251_v17, %v52_v13  ;;  %v114_v20 = vpop.f32.mrb[3].mxu0  ;;  %v128_v22 = vmax.f32 %v120_v14, 0.0 }
  0xdd   :  { %v115_v21 = vadd.f32 %v114_v20, %v42_v18  ;;  %v126_v24 = vmax.f32 %v112_v16, 0.0 }
  0xde   :  { %v129_v23 = vmax.f32 %v123_v19, 0.0 }
  0xdf   :  { %v127_v25 = vmax.f32 %v115_v21, 0.0 }
  0xe0   :  { %v132_v26 = vpack.c.bf16 %v129_v23, %v128_v22 }
  0xe1   :  { %v131_v27 = vpack.c.bf16 %v127_v25, %v126_v24 }
  0xe3   :  { %253 = vmatpush3.bf16.msra.mxu1 %v131_v27 }
  0xe4   :  { %254 = vmatprep.subr.bf16.mxu1 %v281_v9 }
  0xe7   :  { %255 = vmatpush3.bf16.msra.mxu1 %v132_v26 }
  0xea   :  { %257 = vmatmul.mubr.msk.bf16.vlgmr.msra.gmra.mrb[0].mxu1 %vm139_vm2, %v130_v28 }
 0x1bd   :  { %v177_v30 = vpop.f32.mrb[0].mxu1 }
 0x1be   :  { %v178_v31 = vadd.f32 %v177_v30, %v137_v29  ;;  %v258_v32 = vpop.f32.mrb[1].mxu1 }
 0x1bf   :  { %v180_v33 = vpop.f32.mrb[2].mxu1 }
 0x1c0   :  { %v186_v34 = vand.u32 2147483647, %v178_v31  ;;  %v259_v35 = vpop.f32.mrb[3].mxu1  ;;  %v183_v47 = vmax.f32 %v178_v31, 0.0  ;;  %vm184_vm4 = vcmp.ne.f32.partialorder %v178_v31, %v178_v31 }
 0x1c2   :  { %v187_v36 = vsub.f32 0.0, %v186_v34 }
 0x1c4   :  { %v188_v37 = vmul.f32 1.442695, %v187_v36 }
 0x1c6   :  { %268 = vpow2.f32 %v188_v37 }
 0x1d0   :  { %v269_v38 = vpop.eup %268 }
 0x1d1   :  { %v190_v39 = vadd.f32 1.0, %v269_v38  ;;  %v193_v40 = vmul.f32 -0.5, %v269_v38  ;;  %v196_v42 = vand.u32 2147483647, %v269_v38 }
 0x1d3   :  { %270 = vlog2.f32 %v190_v39  ;;  %v194_v41 = vadd.f32 1.0, %v193_v40  ;;  %vm197_vm3 = vcmp.lt.f32.partialorder %v196_v42, 0.0004427343 }
 0x1d5   :  { %v195_v46 = vmul.f32 %v269_v38, %v194_v41 }
 0x1dd   :  { %v271_v43 = vpop.eup %270 }
 0x1de   :  { %v192_v45 = vmul.f32 0.6931472, %v271_v43 }
 0x1e0   :  { %v198_v48 = vsel %vm197_vm3, %v195_v46, %v192_v45 }
 0x1e1   :  { %v199_v50 = vadd.f32 %v198_v48, %v183_v47 }
 0x1e3   :  { %v200_v51 = vsel %vm184_vm4, %v178_v31, %v199_v50 }
 0x1e4   :  { %v214_v52 = vmul.f32 %v212_v49, %v200_v51 }
 0x1e6   :  { %v216_v53 = vrot.slane %v214_v52, 4 }
 0x1e8   :  { %v218_v54 = vadd.f32 %v216_v53, %v178_v31 }
 0x1ea   :  { %272 = vtanh.f32 %v218_v54 }
 0x1f4   :  { %v273_v55 = vpop.eup %272 }
 0x1f5   :  { %274 = vtanh.f32 %v273_v55  ;;  %227 = vst [vmem:[%s362_s6] sm:$0xf] %v273_v55 }
 0x1f6   :  { %276 = vlog2.f32 %v200_v51 }
 0x1ff   :  { %v275_v56 = vpop.eup %274 }
 0x200   :  { %v221_v57 = vmul.f32 %v275_v56, %v275_v56  ;;  %v277_v58 = vpop.eup %276 }
 0x201   :  { %v202_v61 = vmul.f32 0.6931472, %v277_v58 }
 0x202   :  { %v222_v59 = vsub.f32 1.0, %v221_v57 }
 0x203   :  { %v207_v0 = vrot.slane %v202_v61, 4 }
 0x204   :  { %v223_v60 = vadd.f32 1e-07, %v222_v59 }
 0x205   :  { %v209_v1 = vsub.f32 %v205_v63, %v207_v0 }
 0x206   :  { %278 = vlog2.f32 %v223_v60 }
 0x207   :  { %v239_v3 = vadd.f32 -0.9189385, %v209_v1 }
 0x210   :  { %v279_v2 = vpop.eup %278 }
 0x211   :  { %v225_v4 = vmul.f32 0.6931472, %v279_v2 }
 0x213   :  { %v226_v5 = vsub.f32 %v239_v3, %v225_v4 }
 0x215   :  { %228 = vst [vmem:[%s362_s6 + $0x4] sm:$0xf] %v226_v5 }

</bundles_post_ra>
